<compile_context>
chip_gen: v6e
topology: v6e:2x2x1
jax: 0.10.0
libtpu: 0.0.40
codegen_flags: <defaults>
</compile_context>

<pallas_src>
import functools

import numpy as np

import jax
import jax.numpy as jnp
from jax import lax
from jax.experimental import pallas as pl
from jax.experimental.pallas import tpu as pltpu


def _pre_detector_kernel(x_ref, clamp_ref, o_ref, *, H, W):
    """One block of Bc flattened heatmaps; x/o refs are (Bc, H*W).

    clamp_ref is (4, H*W): rows = [left, right, up, down] neighbour clamps,
    +inf where the neighbour is valid and -inf where it falls outside the
    image (reproduces MaxPool2d's implicit -inf padding).
    """
    HW = H * W
    s = jax.nn.sigmoid(x_ref[...])                       # (Bc, H*W)

    clamp_l = clamp_ref[0:1, :]
    clamp_r = clamp_ref[1:2, :]
    clamp_u = clamp_ref[2:3, :]
    clamp_d = clamp_ref[3:4, :]

    # ---- separable 3x3 max pool (stride 1, -inf padding) ----
    # Horizontal pass: right neighbour (i+1) via roll by -1 (== HW-1),
    # left neighbour (i-1) via roll by +1. Out-of-row neighbours are clamped
    # to -inf via jnp.minimum with the precomputed clamp rows.
    nbr_r = jnp.minimum(pltpu.roll(s, shift=HW - 1, axis=1), clamp_r)
    nbr_l = jnp.minimum(pltpu.roll(s, shift=1, axis=1), clamp_l)
    rowmax = jnp.maximum(s, jnp.maximum(nbr_l, nbr_r))

    # Vertical pass: rows are strides of W in the flat dim.
    nbr_d = jnp.minimum(pltpu.roll(rowmax, shift=HW - W, axis=1), clamp_d)
    nbr_u = jnp.minimum(pltpu.roll(rowmax, shift=W, axis=1), clamp_u)
    hmax = jnp.maximum(rowmax, jnp.maximum(nbr_u, nbr_d))

    # Keep only local maxima (exact float equality, matching PyTorch).
    o_ref[...] = jnp.where(hmax == s, s, jnp.zeros_like(s))


def pre_detector(preds_hm, block_channels=None):
    """preds_hm: (N, C, H, W) float logits -> NMS'd sigmoid heatmap."""
    N, C, H, W = preds_hm.shape
    NC = N * C
    HW = H * W
    dtype = preds_hm.dtype
    itemsize = jnp.dtype(dtype).itemsize
    # Sublane packing per dtype: 8 (f32), 16 (bf16/f16), 32 (int8/fp8).
    sublane = 8 * max(1, 4 // itemsize)
    slice_bytes = HW * itemsize

    # Choose how many heatmaps to batch per grid step: target ~2 MiB blocks.
    if block_channels is None:
        target_block_bytes = 2 * 1024 * 1024
        Bc = max(1, target_block_bytes // slice_bytes)
        if Bc >= NC:
            Bc = NC                                   # full sublane dim: always legal
        else:
            Bc = max(sublane, (Bc // sublane) * sublane)
        # Guarantee at least 2 grid steps when possible so ("parallel",)
        # can shard across v7x's two TensorCores.
        if NC >= 2 * sublane:
            Bc = min(Bc, max(sublane, ((NC // 2) // sublane) * sublane))
    else:
        Bc = block_channels

    x = preds_hm.reshape(NC, HW)

    # Trace-time boundary clamps (shape-only constants, hoisted out of the
    # kernel body): +inf where the neighbour is in-bounds, -inf otherwise.
    idx = np.arange(HW)
    col = idx % W
    clamps_np = np.full((4, HW), np.inf, dtype=np.float32)
    clamps_np[0, col == 0] = -np.inf            # left neighbour invalid
    clamps_np[1, col == W - 1] = -np.inf        # right neighbour invalid
    clamps_np[2, idx < W] = -np.inf             # up neighbour invalid
    clamps_np[3, idx >= (H - 1) * W] = -np.inf  # down neighbour invalid
    clamps = jnp.asarray(clamps_np, dtype=dtype)

    # VMEM budget: double-buffered in+out (4 blocks) plus a few block-sized
    # live intermediates (s, rowmax, nbr_*). Floor at 16 MiB (never below the
    # v5e default), cap at 48 MiB to stay inside v7x's 64 MiB physical VMEM.
    block_bytes = Bc * slice_bytes
    vmem_limit = int(min(48 << 20, max(16 << 20, 10 * block_bytes + (2 << 20))))

    grid = pl.cdiv(NC, Bc)   # ragged last block: rows are independent, write
                             # back of the padded tail is clipped by Pallas.

    kernel = functools.partial(_pre_detector_kernel, H=H, W=W)
    out = pl.pallas_call(
        kernel,
        out_shape=jax.ShapeDtypeStruct((NC, HW), dtype),
        grid_spec=pl.GridSpec(
            grid=(grid,),
            in_specs=[
                pl.BlockSpec((Bc, HW), lambda i: (i, 0)),
                pl.BlockSpec((4, HW), lambda i: (0, 0)),   # resident clamps
            ],
            out_specs=pl.BlockSpec((Bc, HW), lambda i: (i, 0)),
        ),
        compiler_params=pltpu.CompilerParams(
            dimension_semantics=("parallel",),
            vmem_limit_bytes=vmem_limit),
    )(x, clamps)

    return out.reshape(N, C, H, W)


def _reference(preds_hm):
    s = jax.nn.sigmoid(preds_hm)
    hmax = lax.reduce_window(
        s, -jnp.inf, lax.max,
        window_dimensions=(1, 1, 3, 3),
        window_strides=(1, 1, 1, 1),
        padding=((0, 0), (0, 0), (1, 1), (1, 1)))
    keep = (hmax == s).astype(s.dtype)
    return s * keep


if __name__ == "__main__":
    key = jax.random.PRNGKey(0)
    x = jax.random.normal(key, (2, 4, 16, 16), dtype=jnp.float32)

    out = pre_detector(x)
    out = jax.block_until_ready(out)

    ref = _reference(x)
    assert out.shape == ref.shape
    assert jnp.allclose(out, ref, atol=1e-6), "mismatch vs reference"

    # Also exercise a ragged-grid / multi-step case (NC not a multiple of Bc).
    x2 = jax.random.normal(jax.random.PRNGKey(1), (3, 7, 16, 16), jnp.float32)
    out2 = jax.block_until_ready(pre_detector(x2, block_channels=8))
    assert jnp.allclose(out2, _reference(x2), atol=1e-6), "ragged mismatch"

    print("KERNEL_OK")
</pallas_src>

<mosaic_0001>
module attributes {stable_mosaic.version = 11 : i64} {
  func.func @_pre_detector_kernel(%arg0: i32, %arg1: memref<8x256xf32, #tpu.memory_space<vmem>>, %arg2: memref<4x256xf32, #tpu.memory_space<vmem>>, %arg3: memref<8x256xf32, #tpu.memory_space<vmem>>) attributes {dimension_semantics = [#tpu.dimension_semantics<parallel>], iteration_bounds = array<i64: 1>, scalar_prefetch = 0 : i64, scratch_operands = 0 : i64, tpu.core_type = #tpu.core_type<tc>, window_params = [{transform_indices = @transform_0, window_bounds = array<i64: 8, 256>}, {pipeline_mode = #tpu.pipeline_mode<synchronous>, transform_indices = @transform_1, window_bounds = array<i64: 4, 256>}, {transform_indices = @transform_2, window_bounds = array<i64: 8, 256>}]} {
    %c0 = arith.constant 0 : index
    %c0_0 = arith.constant 0 : index
    %0 = vector.load %arg1[%c0, %c0_0] : memref<8x256xf32, #tpu.memory_space<vmem>>, vector<8x256xf32>
    %1 = arith.negf %0 : vector<8x256xf32>
    %2 = math.exp %1 : vector<8x256xf32>
    %cst = arith.constant 1.000000e+00 : f32
    %3 = vector.broadcast %cst : f32 to vector<8x256xf32>
    %4 = arith.addf %3, %2 : vector<8x256xf32>
    %5 = arith.divf %3, %4 : vector<8x256xf32>
    %c0_1 = arith.constant 0 : index
    %c0_2 = arith.constant 0 : index
    %6 = vector.load %arg2[%c0_1, %c0_2] : memref<4x256xf32, #tpu.memory_space<vmem>>, vector<1x256xf32>
    %c1 = arith.constant 1 : index
    %c0_3 = arith.constant 0 : index
    %7 = vector.load %arg2[%c1, %c0_3] : memref<4x256xf32, #tpu.memory_space<vmem>>, vector<1x256xf32>
    %c2 = arith.constant 2 : index
    %c0_4 = arith.constant 0 : index
    %8 = vector.load %arg2[%c2, %c0_4] : memref<4x256xf32, #tpu.memory_space<vmem>>, vector<1x256xf32>
    %c3 = arith.constant 3 : index
    %c0_5 = arith.constant 0 : index
    %9 = vector.load %arg2[%c3, %c0_5] : memref<4x256xf32, #tpu.memory_space<vmem>>, vector<1x256xf32>
    %c255_i32 = arith.constant 255 : i32
    %10 = tpu.dynamic_rotate %5 by %c255_i32 dim 1 : vector<8x256xf32>, i32 -> vector<8x256xf32>
    %11 = vector.broadcast %7 : vector<1x256xf32> to vector<8x256xf32>
    %12 = arith.minimumf %10, %11 : vector<8x256xf32>
    %c1_i32 = arith.constant 1 : i32
    %13 = tpu.dynamic_rotate %5 by %c1_i32 dim 1 : vector<8x256xf32>, i32 -> vector<8x256xf32>
    %14 = vector.broadcast %6 : vector<1x256xf32> to vector<8x256xf32>
    %15 = arith.minimumf %13, %14 : vector<8x256xf32>
    %16 = arith.maximumf %15, %12 : vector<8x256xf32>
    %17 = arith.maximumf %5, %16 : vector<8x256xf32>
    %c240_i32 = arith.constant 240 : i32
    %18 = tpu.dynamic_rotate %17 by %c240_i32 dim 1 : vector<8x256xf32>, i32 -> vector<8x256xf32>
    %19 = vector.broadcast %9 : vector<1x256xf32> to vector<8x256xf32>
    %20 = arith.minimumf %18, %19 : vector<8x256xf32>
    %c16_i32 = arith.constant 16 : i32
    %21 = tpu.dynamic_rotate %17 by %c16_i32 dim 1 : vector<8x256xf32>, i32 -> vector<8x256xf32>
    %22 = vector.broadcast %8 : vector<1x256xf32> to vector<8x256xf32>
    %23 = arith.minimumf %21, %22 : vector<8x256xf32>
    %24 = arith.maximumf %23, %20 : vector<8x256xf32>
    %25 = arith.maximumf %17, %24 : vector<8x256xf32>
    %26 = arith.cmpf oeq, %25, %5 : vector<8x256xf32>
    %cst_6 = arith.constant 0.000000e+00 : f32
    %27 = vector.broadcast %cst_6 : f32 to vector<8x256xf32>
    %28 = arith.select %26, %5, %27 : vector<8x256xi1>, vector<8x256xf32>
    %c0_7 = arith.constant 0 : index
    %c0_8 = arith.constant 0 : index
    %29 = vector.load %arg3[%c0_7, %c0_8] : memref<8x256xf32, #tpu.memory_space<vmem>>, vector<8x256xf32>
    tpu.vector_store %arg3[%c0_7, %c0_8], %28 {strides = array<i32>} : memref<8x256xf32, #tpu.memory_space<vmem>>, vector<8x256xf32>,
    return
  }
  func.func @transform_0(%arg0: i32) -> (i32, i32) {
    %c0_i32 = arith.constant 0 : i32
    %c0_i32_0 = arith.constant 0 : i32
    return %arg0, %c0_i32 : i32, i32
  }
  func.func @transform_1(%arg0: i32) -> (i32, i32) {
    %c0_i32 = arith.constant 0 : i32
    %c0_i32_0 = arith.constant 0 : i32
    %c0_i32_1 = arith.constant 0 : i32
    return %c0_i32, %c0_i32_0 : i32, i32
  }
  func.func @transform_2(%arg0: i32) -> (i32, i32) {
    %c0_i32 = arith.constant 0 : i32
    %c0_i32_0 = arith.constant 0 : i32
    return %arg0, %c0_i32 : i32, i32
  }
}

</mosaic_0001>

<bundles_post_ra>
// kernel: tpu_custom_call.1
= control target key start
LH: loop header
LB: loop body
LE: loop exit
PB: predicated region body
PF: predicated region fallthrough
CT: control target
= control target key end

     0   :  { %7 = vsyncpa [#allocation3], 0  ;;  %s297_s0 = inlined_call_operand.hbm [shape: f32[8,256], index: 0, kind: input, shape index: {}]   ;;  %s298_s1 = inlined_call_operand.hbm [shape: f32[4,256], index: 1, kind: input, shape index: {}]   ;;  %s299_s2 = inlined_call_operand.hbm [shape: f32[8,256], index: 2, kind: output, shape index: {}]  }
   0x1   :  { %8 = vsyncpa [#allocation6], 0 }
   0x2   :  { %9 = vsyncpa [#allocation4], 0  ;;  %s252_s9 = smov [#allocation2]   ;;  %s253_s11 = smov [#allocation5]  }
   0x3   :  { %s16_s10 = sshll.u32 %s252_s9, 4  ;;  %s26_s12 = sshll.u32 %s253_s11, 4  ;;  %s17_s10 = int_to_ptr.vmem [resolvable:$true] %s16_s10  ;;  %s27_s12 = int_to_ptr.vmem [resolvable:$true] %s26_s12 }
   0x4   :  { %s194_s13 = scalar_lea.vmem %s17_s10, 256  ;;  %p199_p1 = scmp.lt.s32.totalorder %s17_s10, %s17_s10 }
   0x5   :  { %p195_p0 = scmp.ne.s32.totalorder %s17_s10, %s194_s13  ;;  %p200_p2 = scmp.lt.s32.totalorder %s194_s13, %s194_s13 }
   0x7   :  { %p201_p3 = por %p200_p2, %p199_p1 }
   0x9   :  { %p202_p4 = pnand %p201_p3, %p195_p0 }
   0xb   :  { %205 = shalt.err (!%p202_p4)
}
   0xc   :  { %19 = dma.hbm_to_vmem [thread:$0]  %s297_s0, 256, %s17_s10, [#allocation3]  }
   0xd   :  { %s214_s16 = scalar_lea.vmem %s27_s12, 128  ;;  %p219_p6 = scmp.lt.s32.totalorder %s27_s12, %s27_s12 }
   0xe   :  { %p215_p5 = scmp.ne.s32.totalorder %s27_s12, %s214_s16  ;;  %p220_p7 = scmp.lt.s32.totalorder %s214_s16, %s214_s16 }
  0x10   :  { %p221_p8 = por %p220_p7, %p219_p6 }
  0x12   :  { %p222_p9 = pnand %p221_p8, %p215_p5 }
  0x14   :  { %225 = shalt.err (!%p222_p9)
}
  0x15   :  { %29 = dma.hbm_to_vmem [thread:$0]  %s298_s1, 128, %s27_s12, [#allocation6]  }
  0x16   :  { %246 = dma.done.wait [#allocation3], 256  }
  0x17   :  { %247 = vsyncadd [#allocation3], 4294967040 }
  0x18   :  { %248 = dma.done.wait [#allocation6], 128  }
  0x19   :  { %249 = vsyncadd [#allocation6], 4294967168  ;;  %v36_v0 = vld [vmem:[#allocation2] sm:$0xff]  ;;  %v37_v1 = vld [vmem:[#allocation2 + $0x8] sm:$0xff]  ;;  %s254_s0 = smov 1   ;;  %s255_s1 = smov 127   ;;  %v61_v10 = vlaneseq }
  0x1a   :  { %v169_v2 = vmul.f32 -1.442695, %v36_v0  ;;  %v170_v3 = vmul.f32 -1.442695, %v37_v1  ;;  %s256_s19 = smov 112   ;;  %s257_s20 = smov 16  }
  0x1b   :  { %v68_v11 = vshrl.u32 %v61_v10, 7  ;;  %v62_v12 = vand.u32 127, %v61_v10  ;;  %v50_v14 = vld [vmem:[#allocation5] ss:$4 sm:$0x3]  ;;  %s258_s21 = smov [#allocation7]  }
  0x1c   :  { %178 = vpow2.f32 %v169_v2  ;;  %v52_v16 = vld [vmem:[#allocation5 + $0x1] ss:$4 sm:$0x3]  ;;  %v56_v37 = vld [vmem:[#allocation5 + $0x3] ss:$4 sm:$0x3] }
  0x1d   :  { %180 = vpow2.f32 %v170_v3  ;;  %v69_v13 = vsub.s32 0, %v68_v11  ;;  %v73_v15 = vsub.s32 1, %v68_v11  ;;  %vm83_vm0 = vcmp.lt.s32.totalorder %v62_v12, 1  ;;  %v54_v38 = vld [vmem:[#allocation5 + $0x2] ss:$4 sm:$0x3] }
  0x1e   :  { %vm63_vm1 = vcmp.lt.s32.totalorder %v62_v12, 127  ;;  %vm107_vm2 = vcmp.lt.s32.totalorder %v62_v12, 112  ;;  %vm127_vm3 = vcmp.lt.s32.totalorder %v62_v12, 16  ;;  %s159_s22 = sshll.u32 %s258_s21, 4  ;;  %s160_s22 = int_to_ptr.vmem [resolvable:$true] %s159_s22 }
  0x1f   :  { %v90_v19 = vrot.slane %v50_v14, %v69_v13  ;;  %v94_v20 = vrot.slane %v50_v14, %v73_v15  ;;  %v70_v21 = vrot.slane %v52_v16, %v69_v13  ;;  %v74_v22 = vrot.slane %v52_v16, %v73_v15  ;;  %s226_s23 = scalar_lea.vmem %s160_s22, 256  ;;  %p231_p11 = scmp.lt.s32.totalorder %s160_s22, %s160_s22 }
  0x20   :  { %v114_v41 = vrot.slane %v56_v37, %v69_v13  ;;  %v118_v42 = vrot.slane %v56_v37, %v73_v15  ;;  %v134_v43 = vrot.slane %v54_v38, %v69_v13  ;;  %v138_v44 = vrot.slane %v54_v38, %v73_v15  ;;  %p227_p10 = scmp.ne.s32.totalorder %s160_s22, %s226_s23  ;;  %p232_p12 = scmp.lt.s32.totalorder %s226_s23, %s226_s23 }
  0x22   :  { %p233_p13 = por %p232_p12, %p231_p11 }
  0x24   :  { %p234_p0 = pnand %p233_p13, %p227_p10 }
  0x29   :  { %v179_v4 = vpop.eup %178 }
  0x2a   :  { %v181_v5 = vpop.eup %180  ;;  %v44_v6 = vadd.f32 1.0, %v179_v4 }
  0x2b   :  { %v45_v7 = vadd.f32 1.0, %v181_v5 }
  0x2c   :  { %182 = vrcp.f32 %v44_v6 }
  0x2d   :  { %184 = vrcp.f32 %v45_v7 }
  0x39   :  { %v280_v8 = vpop.eup %182 }
  0x3a   :  { %79 = vrot.lane.b32.xlu1 %v280_v8, %s254_s0  ;;  %57 = vrot.lane.b32.xlu0 %v280_v8, %s255_s1  ;;  %v284_v9 = vpop.eup %184 }
  0x3e   :  { %81 = vrot.lane.b32.xlu1 %v284_v9, %s254_s0  ;;  %59 = vrot.lane.b32.xlu0 %v284_v9, %s255_s1 }
  0xac   :  { %v80_v17 = vpop.permute.xlu1 %79  ;;  %v58_v18 = vpop.permute.xlu0 %57 }
  0xb0   :  { %v82_v23 = vpop.permute.xlu1 %81  ;;  %v60_v24 = vpop.permute.xlu0 %59 }
  0xb1   :  { %v84_v25 = vsel %vm83_vm0, %v80_v17, %v82_v23  ;;  %v85_v26 = vsel %vm83_vm0, %v82_v23, %v80_v17  ;;  %v64_v27 = vsel %vm63_vm1, %v58_v18, %v60_v24  ;;  %v65_v28 = vsel %vm63_vm1, %v60_v24, %v58_v18 }
  0xb2   :  { %v97_v29 = vmin.f32 %v85_v26, %v90_v19  ;;  %v98_v30 = vmin.f32 %v84_v25, %v94_v20  ;;  %v77_v31 = vmin.f32 %v64_v27, %v70_v21  ;;  %v78_v32 = vmin.f32 %v65_v28, %v74_v22 }
  0xb4   :  { %v99_v33 = vmax.f32 %v97_v29, %v77_v31  ;;  %v100_v34 = vmax.f32 %v98_v30, %v78_v32 }
  0xb6   :  { %v102_v35 = vmax.f32 %v284_v9, %v100_v34  ;;  %v101_v36 = vmax.f32 %v280_v8, %v99_v33 }
  0xb8   :  { %105 = vrot.lane.b32.xlu1 %v102_v35, %s256_s19  ;;  %103 = vrot.lane.b32.xlu0 %v101_v36, %s256_s19 }
  0xbc   :  { %125 = vrot.lane.b32.xlu1 %v102_v35, %s257_s20  ;;  %123 = vrot.lane.b32.xlu0 %v101_v36, %s257_s20 }
 0x12a   :  { %v106_v39 = vpop.permute.xlu1 %105  ;;  %v104_v40 = vpop.permute.xlu0 %103 }
 0x12b   :  { %v108_v45 = vsel %vm107_vm2, %v104_v40, %v106_v39  ;;  %v109_v46 = vsel %vm107_vm2, %v106_v39, %v104_v40 }
 0x12c   :  { %v121_v51 = vmin.f32 %v108_v45, %v114_v41  ;;  %v122_v52 = vmin.f32 %v109_v46, %v118_v42 }
 0x12e   :  { %v126_v47 = vpop.permute.xlu1 %125  ;;  %v124_v48 = vpop.permute.xlu0 %123 }
 0x12f   :  { %v128_v49 = vsel %vm127_vm3, %v124_v48, %v126_v47  ;;  %v129_v50 = vsel %vm127_vm3, %v126_v47, %v124_v48 }
 0x130   :  { %v141_v53 = vmin.f32 %v129_v50, %v134_v43  ;;  %v142_v54 = vmin.f32 %v128_v49, %v138_v44 }
 0x132   :  { %v143_v55 = vmax.f32 %v141_v53, %v121_v51  ;;  %v144_v56 = vmax.f32 %v142_v54, %v122_v52 }
 0x134   :  { %v145_v57 = vmax.f32 %v101_v36, %v143_v55  ;;  %v146_v58 = vmax.f32 %v102_v35, %v144_v56 }
 0x136   :  { %vm147_vm4 = vcmp.eq.f32.partialorder %v145_v57, %v280_v8  ;;  %vm148_vm5 = vcmp.eq.f32.partialorder %v146_v58, %v284_v9 }
 0x137   :  { %v149_v59 = vsel %vm147_vm4, %v280_v8, 0.0  ;;  %v150_v60 = vsel %vm148_vm5, %v284_v9, 0.0 }
 0x138   :  { %151 = vst [vmem:[#allocation7] sm:$0xff] %v149_v59  ;;  %152 = vst [vmem:[#allocation7 + $0x8] sm:$0xff] %v150_v60 }
 0x139   :  { %237 = shalt.err (!%p234_p0)
}
 0x13a   :  { %162 = dma.vmem_to_hbm [thread:$0]  %s160_s22, 256, %s299_s2, [#allocation4]  }
 0x13b   :  { %250 = dma.done.wait [#allocation4], 256  }
 0x13c   :  { %251 = vsyncadd [#allocation4], 4294967040 }
 0x13d   :  { %166 = vsyncpa [#allocation3], 1 }
 0x13e   :  { %167 = vsyncpa [#allocation6], 1 }
 0x13f   :  { %168 = vsyncpa [#allocation4], 1 }

</bundles_post_ra>
